<compile_context>
chip_gen: v7x
topology: tpu7x:2x2x1
jax: 0.10.0
libtpu: 0.0.40
codegen_flags: <defaults>
</compile_context>

<pallas_src>
import functools

import jax
import jax.numpy as jnp
from jax import lax
from jax.experimental import pallas as pl
from jax.experimental.pallas import tpu as pltpu


def _lstm_mlp_kernel(x_ref, wih_ref, whh_ref, bg_ref,
                     w1_ref, b1_ref, w2_ref, b2_ref, w3_ref, b3_ref,
                     out_ref, ih_sc, hh_sc, *, seq_len, batch, hidden):
    S, B, H = seq_len, batch, hidden

    # ---- (1) Time-independent input projection, batched over all S*B rows ----
    #   ih[t*B + b, :] = x[t, b, :] @ W_ih^T + (b_ih + b_hh)
    ih_sc[...] = (
        jnp.dot(x_ref[...], wih_ref[...], preferred_element_type=jnp.float32)
        + bg_ref[...]
    )

    # ---- (2) Serial LSTM recurrence (the only part that cannot be batched) ----
    def step(t, carry):
        h, c = carry
        row = t * B
        gates = ih_sc[pl.ds(row, B), :] + jnp.dot(
            h, whh_ref[...], preferred_element_type=jnp.float32)   # (B, 4H)

        # Full-vreg transcendentals (EUP), then lane-slice the gates.
        sig = jax.nn.sigmoid(gates)
        tnh = jnp.tanh(gates)
        i_g = sig[:, 0 * H:1 * H]
        f_g = sig[:, 1 * H:2 * H]
        g_g = tnh[:, 2 * H:3 * H]
        o_g = sig[:, 3 * H:4 * H]

        c_new = f_g * c + i_g * g_g
        h_new = o_g * jnp.tanh(c_new)

        hh_sc[pl.ds(row, B), :] = h_new        # stash h_t for the batched MLP
        return (h_new, c_new)

    h0 = jnp.zeros((B, H), jnp.float32)
    c0 = jnp.zeros((B, H), jnp.float32)        # matches torch.zeros init
    lax.fori_loop(0, S, step, (h0, c0), unroll=True)

    # ---- (3) Batched MLP head over the stacked (S*B, H) hidden states ----
    h_all = hh_sc[...]
    y = jnp.maximum(
        jnp.dot(h_all, w1_ref[...], preferred_element_type=jnp.float32) + b1_ref[...], 0.0)
    y = jnp.maximum(
        jnp.dot(y, w2_ref[...], preferred_element_type=jnp.float32) + b2_ref[...], 0.0)
    y = jnp.dot(y, w3_ref[...], preferred_element_type=jnp.float32) + b3_ref[...]

    # Single lane-slab store of the whole output.
    out_ref[...] = y.astype(out_ref.dtype)


def predictor_lstm_forward(x, params):
    """x: (seq_len, batch, n_features) float32 -> (seq_len, batch, n_features)."""
    S, B, F = x.shape
    H = params["w_hh_t"].shape[0]

    # Flatten (S, B) -> rows so the kernel never reshapes in VMEM.
    x2d = x.reshape(S * B, F)

    kernel = functools.partial(_lstm_mlp_kernel, seq_len=S, batch=B, hidden=H)
    vmem = pl.BlockSpec(memory_space=pltpu.MemorySpace.VMEM)

    out2d = pl.pallas_call(
        kernel,
        out_shape=jax.ShapeDtypeStruct((S * B, F), x.dtype),
        in_specs=[vmem] * 10,
        out_specs=vmem,
        scratch_shapes=[
            pltpu.VMEM((S * B, 4 * H), jnp.float32),   # precomputed input gates
            pltpu.VMEM((S * B, H), jnp.float32),       # stacked hidden states
        ],
    )(x2d,
      params["w_ih_t"], params["w_hh_t"], params["b_gates"],
      params["w1_t"], params["b1"],
      params["w2_t"], params["b2"],
      params["w3_t"], params["b3"])

    return out2d.reshape(S, B, F)


def init_params(key, n_features, hidden_size):
    """Deterministic synthetic parameters (PyTorch-like uniform(-1/sqrt(H), 1/sqrt(H)))."""
    H, F = hidden_size, n_features
    k = 1.0 / jnp.sqrt(jnp.float32(H))
    keys = jax.random.split(key, 12)
    u = lambda kk, shape: jax.random.uniform(kk, shape, jnp.float32, -k, k)

    w_ih = u(keys[0], (4 * H, F))
    w_hh = u(keys[1], (4 * H, H))
    b_ih = u(keys[2], (4 * H,))
    b_hh = u(keys[3], (4 * H,))
    w1 = u(keys[4], (H, H)); b1 = u(keys[5], (H,))
    w2 = u(keys[6], (H, H)); b2 = u(keys[7], (H,))
    w3 = u(keys[8], (F, H)); b3 = u(keys[9], (F,))

    return {
        "w_ih_t": w_ih.T,                      # (F, 4H)
        "w_hh_t": w_hh.T,                      # (H, 4H)
        "b_gates": (b_ih + b_hh)[None, :],     # (1, 4H)  (= b_ih + b_hh)
        "w1_t": w1.T, "b1": b1[None, :],
        "w2_t": w2.T, "b2": b2[None, :],
        "w3_t": w3.T, "b3": b3[None, :],
    }


def reference_forward(x, params):
    """Pure-JAX reference matching PyTorch nn.LSTM + MLP semantics."""
    S, B, F = x.shape
    H = params["w_hh_t"].shape[0]
    h = jnp.zeros((B, H), jnp.float32)
    c = jnp.zeros((B, H), jnp.float32)

    def step(carry, x_t):
        h, c = carry
        gates = x_t @ params["w_ih_t"] + h @ params["w_hh_t"] + params["b_gates"]
        i = jax.nn.sigmoid(gates[:, 0 * H:1 * H])
        f = jax.nn.sigmoid(gates[:, 1 * H:2 * H])
        g = jnp.tanh(gates[:, 2 * H:3 * H])
        o = jax.nn.sigmoid(gates[:, 3 * H:4 * H])
        c = f * c + i * g
        h = o * jnp.tanh(c)
        y = jnp.maximum(h @ params["w1_t"] + params["b1"], 0.0)
        y = jnp.maximum(y @ params["w2_t"] + params["b2"], 0.0)
        y = y @ params["w3_t"] + params["b3"]
        return (h, c), y

    _, ys = jax.lax.scan(step, (h, c), x)
    return ys


if __name__ == "__main__":
    SEQ, BATCH, N_FEATURES, HIDDEN = 8, 2, 4, 32   # 4*HIDDEN = 128 (one lane tile)

    key = jax.random.PRNGKey(0)
    k_x, k_p = jax.random.split(key)
    x = jax.random.normal(k_x, (SEQ, BATCH, N_FEATURES), jnp.float32)
    params = init_params(k_p, N_FEATURES, HIDDEN)

    out = predictor_lstm_forward(x, params)
    out = jax.block_until_ready(out)

    ref = jax.block_until_ready(reference_forward(x, params))
    assert out.shape == (SEQ, BATCH, N_FEATURES)
    assert jnp.allclose(out, ref, rtol=1e-4, atol=1e-4), "mismatch vs reference"

    # TODO(synk): training path (L1Loss + Adam step) is out of scope for the
    # forward-pass kernel and is not implemented here.
    print("KERNEL_OK")
</pallas_src>

<mosaic_0001>
module attributes {stable_mosaic.version = 11 : i64} {
  func.func @_lstm_mlp_kernel(%arg0: memref<16x4xf32, #tpu.memory_space<vmem>>, %arg1: memref<4x128xf32, #tpu.memory_space<vmem>>, %arg2: memref<32x128xf32, #tpu.memory_space<vmem>>, %arg3: memref<1x128xf32, #tpu.memory_space<vmem>>, %arg4: memref<32x32xf32, #tpu.memory_space<vmem>>, %arg5: memref<1x32xf32, #tpu.memory_space<vmem>>, %arg6: memref<32x32xf32, #tpu.memory_space<vmem>>, %arg7: memref<1x32xf32, #tpu.memory_space<vmem>>, %arg8: memref<32x4xf32, #tpu.memory_space<vmem>>, %arg9: memref<1x4xf32, #tpu.memory_space<vmem>>, %arg10: memref<16x4xf32, #tpu.memory_space<vmem>>, %arg11: memref<16x128xf32, #tpu.memory_space<vmem>>, %arg12: memref<16x32xf32, #tpu.memory_space<vmem>>) attributes {dimension_semantics = [], scalar_prefetch = 0 : i64, scratch_operands = 2 : i64, tpu.core_type = #tpu.core_type<tc>} {
    %c0 = arith.constant 0 : index
    %c0_0 = arith.constant 0 : index
    %0 = vector.load %arg0[%c0, %c0_0] : memref<16x4xf32, #tpu.memory_space<vmem>>, vector<16x4xf32>
    %c0_1 = arith.constant 0 : index
    %c0_2 = arith.constant 0 : index
    %1 = vector.load %arg1[%c0_1, %c0_2] : memref<4x128xf32, #tpu.memory_space<vmem>>, vector<4x128xf32>
    %cst = arith.constant dense<0.000000e+00> : vector<16x128xf32>
    %2 = tpu.matmul %0, %1, %cst {dimension_numbers = #tpu.dot_dimension_numbers<[1], [0], [0], [1], [0, 0, 1, 1], [], []>} : vector<16x4xf32>, vector<4x128xf32>, vector<16x128xf32> -> vector<16x128xf32>
    %c0_3 = arith.constant 0 : index
    %c0_4 = arith.constant 0 : index
    %3 = vector.load %arg3[%c0_3, %c0_4] : memref<1x128xf32, #tpu.memory_space<vmem>>, vector<1x128xf32>
    %4 = vector.broadcast %3 : vector<1x128xf32> to vector<16x128xf32>
    %5 = arith.addf %2, %4 : vector<16x128xf32>
    %c0_5 = arith.constant 0 : index
    %c0_6 = arith.constant 0 : index
    %6 = vector.load %arg11[%c0_5, %c0_6] : memref<16x128xf32, #tpu.memory_space<vmem>>, vector<16x128xf32>
    tpu.vector_store %arg11[%c0_5, %c0_6], %5 {strides = array<i32>} : memref<16x128xf32, #tpu.memory_space<vmem>>, vector<16x128xf32>,
    %cst_7 = arith.constant 0.000000e+00 : f32
    %7 = vector.broadcast %cst_7 : f32 to vector<2x32xf32>
    %cst_8 = arith.constant 0.000000e+00 : f32
    %8 = vector.broadcast %cst_8 : f32 to vector<2x32xf32>
    %c0_i32 = arith.constant 0 : i32
    %c2_i32 = arith.constant 2 : i32
    %9 = arith.muli %c0_i32, %c2_i32 : i32
    %10 = arith.index_cast %9 : i32 to index
    %c0_9 = arith.constant 0 : index
    %11 = vector.load %arg11[%10, %c0_9] : memref<16x128xf32, #tpu.memory_space<vmem>>, vector<2x128xf32>
    %c0_10 = arith.constant 0 : index
    %c0_11 = arith.constant 0 : index
    %12 = vector.load %arg2[%c0_10, %c0_11] : memref<32x128xf32, #tpu.memory_space<vmem>>, vector<32x128xf32>
    %cst_12 = arith.constant dense<0.000000e+00> : vector<2x128xf32>
    %13 = tpu.matmul %7, %12, %cst_12 {dimension_numbers = #tpu.dot_dimension_numbers<[1], [0], [0], [1], [0, 0, 1, 1], [], []>} : vector<2x32xf32>, vector<32x128xf32>, vector<2x128xf32> -> vector<2x128xf32>
    %14 = arith.addf %11, %13 : vector<2x128xf32>
    %15 = arith.negf %14 : vector<2x128xf32>
    %16 = math.exp %15 : vector<2x128xf32>
    %cst_13 = arith.constant 1.000000e+00 : f32
    %17 = vector.broadcast %cst_13 : f32 to vector<2x128xf32>
    %18 = arith.addf %17, %16 : vector<2x128xf32>
    %19 = arith.divf %17, %18 : vector<2x128xf32>
    %20 = math.tanh %14 : vector<2x128xf32>
    %21 = vector.extract_strided_slice %19 {offsets = [0, 0], sizes = [2, 32], strides = [1, 1]} : vector<2x128xf32> to vector<2x32xf32>
    %22 = vector.extract_strided_slice %19 {offsets = [0, 32], sizes = [2, 32], strides = [1, 1]} : vector<2x128xf32> to vector<2x32xf32>
    %23 = vector.extract_strided_slice %20 {offsets = [0, 64], sizes = [2, 32], strides = [1, 1]} : vector<2x128xf32> to vector<2x32xf32>
    %24 = vector.extract_strided_slice %19 {offsets = [0, 96], sizes = [2, 32], strides = [1, 1]} : vector<2x128xf32> to vector<2x32xf32>
    %25 = arith.mulf %22, %8 : vector<2x32xf32>
    %26 = arith.mulf %21, %23 : vector<2x32xf32>
    %27 = arith.addf %25, %26 : vector<2x32xf32>
    %28 = math.tanh %27 : vector<2x32xf32>
    %29 = arith.mulf %24, %28 : vector<2x32xf32>
    %30 = arith.index_cast %9 : i32 to index
    %c0_14 = arith.constant 0 : index
    %31 = vector.load %arg12[%30, %c0_14] : memref<16x32xf32, #tpu.memory_space<vmem>>, vector<2x32xf32>
    tpu.vector_store %arg12[%30, %c0_14], %29 {strides = array<i32>} : memref<16x32xf32, #tpu.memory_space<vmem>>, vector<2x32xf32>,
    %c1_i32 = arith.constant 1 : i32
    %c2_i32_15 = arith.constant 2 : i32
    %32 = arith.muli %c1_i32, %c2_i32_15 : i32
    %33 = arith.index_cast %32 : i32 to index
    %c0_16 = arith.constant 0 : index
    %34 = vector.load %arg11[%33, %c0_16] : memref<16x128xf32, #tpu.memory_space<vmem>>, vector<2x128xf32>
    %c0_17 = arith.constant 0 : index
    %c0_18 = arith.constant 0 : index
    %35 = vector.load %arg2[%c0_17, %c0_18] : memref<32x128xf32, #tpu.memory_space<vmem>>, vector<32x128xf32>
    %cst_19 = arith.constant dense<0.000000e+00> : vector<2x128xf32>
    %36 = tpu.matmul %29, %35, %cst_19 {dimension_numbers = #tpu.dot_dimension_numbers<[1], [0], [0], [1], [0, 0, 1, 1], [], []>} : vector<2x32xf32>, vector<32x128xf32>, vector<2x128xf32> -> vector<2x128xf32>
    %37 = arith.addf %34, %36 : vector<2x128xf32>
    %38 = arith.negf %37 : vector<2x128xf32>
    %39 = math.exp %38 : vector<2x128xf32>
    %cst_20 = arith.constant 1.000000e+00 : f32
    %40 = vector.broadcast %cst_20 : f32 to vector<2x128xf32>
    %41 = arith.addf %40, %39 : vector<2x128xf32>
    %42 = arith.divf %40, %41 : vector<2x128xf32>
    %43 = math.tanh %37 : vector<2x128xf32>
    %44 = vector.extract_strided_slice %42 {offsets = [0, 0], sizes = [2, 32], strides = [1, 1]} : vector<2x128xf32> to vector<2x32xf32>
    %45 = vector.extract_strided_slice %42 {offsets = [0, 32], sizes = [2, 32], strides = [1, 1]} : vector<2x128xf32> to vector<2x32xf32>
    %46 = vector.extract_strided_slice %43 {offsets = [0, 64], sizes = [2, 32], strides = [1, 1]} : vector<2x128xf32> to vector<2x32xf32>
    %47 = vector.extract_strided_slice %42 {offsets = [0, 96], sizes = [2, 32], strides = [1, 1]} : vector<2x128xf32> to vector<2x32xf32>
    %48 = arith.mulf %45, %27 : vector<2x32xf32>
    %49 = arith.mulf %44, %46 : vector<2x32xf32>
    %50 = arith.addf %48, %49 : vector<2x32xf32>
    %51 = math.tanh %50 : vector<2x32xf32>
    %52 = arith.mulf %47, %51 : vector<2x32xf32>
    %53 = arith.index_cast %32 : i32 to index
    %c0_21 = arith.constant 0 : index
    %54 = vector.load %arg12[%53, %c0_21] : memref<16x32xf32, #tpu.memory_space<vmem>>, vector<2x32xf32>
    tpu.vector_store %arg12[%53, %c0_21], %52 {strides = array<i32>} : memref<16x32xf32, #tpu.memory_space<vmem>>, vector<2x32xf32>,
    %c2_i32_22 = arith.constant 2 : i32
    %c2_i32_23 = arith.constant 2 : i32
    %55 = arith.muli %c2_i32_22, %c2_i32_23 : i32
    %56 = arith.index_cast %55 : i32 to index
    %c0_24 = arith.constant 0 : index
    %57 = vector.load %arg11[%56, %c0_24] : memref<16x128xf32, #tpu.memory_space<vmem>>, vector<2x128xf32>
    %c0_25 = arith.constant 0 : index
    %c0_26 = arith.constant 0 : index
    %58 = vector.load %arg2[%c0_25, %c0_26] : memref<32x128xf32, #tpu.memory_space<vmem>>, vector<32x128xf32>
    %cst_27 = arith.constant dense<0.000000e+00> : vector<2x128xf32>
    %59 = tpu.matmul %52, %58, %cst_27 {dimension_numbers = #tpu.dot_dimension_numbers<[1], [0], [0], [1], [0, 0, 1, 1], [], []>} : vector<2x32xf32>, vector<32x128xf32>, vector<2x128xf32> -> vector<2x128xf32>
    %60 = arith.addf %57, %59 : vector<2x128xf32>
    %61 = arith.negf %60 : vector<2x128xf32>
    %62 = math.exp %61 : vector<2x128xf32>
    %cst_28 = arith.constant 1.000000e+00 : f32
    %63 = vector.broadcast %cst_28 : f32 to vector<2x128xf32>
    %64 = arith.addf %63, %62 : vector<2x128xf32>
    %65 = arith.divf %63, %64 : vector<2x128xf32>
    %66 = math.tanh %60 : vector<2x128xf32>
    %67 = vector.extract_strided_slice %65 {offsets = [0, 0], sizes = [2, 32], strides = [1, 1]} : vector<2x128xf32> to vector<2x32xf32>
    %68 = vector.extract_strided_slice %65 {offsets = [0, 32], sizes = [2, 32], strides = [1, 1]} : vector<2x128xf32> to vector<2x32xf32>
    %69 = vector.extract_strided_slice %66 {offsets = [0, 64], sizes = [2, 32], strides = [1, 1]} : vector<2x128xf32> to vector<2x32xf32>
    %70 = vector.extract_strided_slice %65 {offsets = [0, 96], sizes = [2, 32], strides = [1, 1]} : vector<2x128xf32> to vector<2x32xf32>
    %71 = arith.mulf %68, %50 : vector<2x32xf32>
    %72 = arith.mulf %67, %69 : vector<2x32xf32>
    %73 = arith.addf %71, %72 : vector<2x32xf32>
    %74 = math.tanh %73 : vector<2x32xf32>
    %75 = arith.mulf %70, %74 : vector<2x32xf32>
    %76 = arith.index_cast %55 : i32 to index
    %c0_29 = arith.constant 0 : index
    %77 = vector.load %arg12[%76, %c0_29] : memref<16x32xf32, #tpu.memory_space<vmem>>, vector<2x32xf32>
    tpu.vector_store %arg12[%76, %c0_29], %75 {strides = array<i32>} : memref<16x32xf32, #tpu.memory_space<vmem>>, vector<2x32xf32>,
    %c3_i32 = arith.constant 3 : i32
    %c2_i32_30 = arith.constant 2 : i32
    %78 = arith.muli %c3_i32, %c2_i32_30 : i32
    %79 = arith.index_cast %78 : i32 to index
    %c0_31 = arith.constant 0 : index
    %80 = vector.load %arg11[%79, %c0_31] : memref<16x128xf32, #tpu.memory_space<vmem>>, vector<2x128xf32>
    %c0_32 = arith.constant 0 : index
    %c0_33 = arith.constant 0 : index
    %81 = vector.load %arg2[%c0_32, %c0_33] : memref<32x128xf32, #tpu.memory_space<vmem>>, vector<32x128xf32>
    %cst_34 = arith.constant dense<0.000000e+00> : vector<2x128xf32>
    %82 = tpu.matmul %75, %81, %cst_34 {dimension_numbers = #tpu.dot_dimension_numbers<[1], [0], [0], [1], [0, 0, 1, 1], [], []>} : vector<2x32xf32>, vector<32x128xf32>, vector<2x128xf32> -> vector<2x128xf32>
    %83 = arith.addf %80, %82 : vector<2x128xf32>
    %84 = arith.negf %83 : vector<2x128xf32>
    %85 = math.exp %84 : vector<2x128xf32>
    %cst_35 = arith.constant 1.000000e+00 : f32
    %86 = vector.broadcast %cst_35 : f32 to vector<2x128xf32>
    %87 = arith.addf %86, %85 : vector<2x128xf32>
    %88 = arith.divf %86, %87 : vector<2x128xf32>
    %89 = math.tanh %83 : vector<2x128xf32>
    %90 = vector.extract_strided_slice %88 {offsets = [0, 0], sizes = [2, 32], strides = [1, 1]} : vector<2x128xf32> to vector<2x32xf32>
    %91 = vector.extract_strided_slice %88 {offsets = [0, 32], sizes = [2, 32], strides = [1, 1]} : vector<2x128xf32> to vector<2x32xf32>
    %92 = vector.extract_strided_slice %89 {offsets = [0, 64], sizes = [2, 32], strides = [1, 1]} : vector<2x128xf32> to vector<2x32xf32>
    %93 = vector.extract_strided_slice %88 {offsets = [0, 96], sizes = [2, 32], strides = [1, 1]} : vector<2x128xf32> to vector<2x32xf32>
    %94 = arith.mulf %91, %73 : vector<2x32xf32>
    %95 = arith.mulf %90, %92 : vector<2x32xf32>
    %96 = arith.addf %94, %95 : vector<2x32xf32>
    %97 = math.tanh %96 : vector<2x32xf32>
    %98 = arith.mulf %93, %97 : vector<2x32xf32>
    %99 = arith.index_cast %78 : i32 to index
    %c0_36 = arith.constant 0 : index
    %100 = vector.load %arg12[%99, %c0_36] : memref<16x32xf32, #tpu.memory_space<vmem>>, vector<2x32xf32>
    tpu.vector_store %arg12[%99, %c0_36], %98 {strides = array<i32>} : memref<16x32xf32, #tpu.memory_space<vmem>>, vector<2x32xf32>,
    %c4_i32 = arith.constant 4 : i32
    %c2_i32_37 = arith.constant 2 : i32
    %101 = arith.muli %c4_i32, %c2_i32_37 : i32
    %102 = arith.index_cast %101 : i32 to index
    %c0_38 = arith.constant 0 : index
    %103 = vector.load %arg11[%102, %c0_38] : memref<16x128xf32, #tpu.memory_space<vmem>>, vector<2x128xf32>
    %c0_39 = arith.constant 0 : index
    %c0_40 = arith.constant 0 : index
    %104 = vector.load %arg2[%c0_39, %c0_40] : memref<32x128xf32, #tpu.memory_space<vmem>>, vector<32x128xf32>
    %cst_41 = arith.constant dense<0.000000e+00> : vector<2x128xf32>
    %105 = tpu.matmul %98, %104, %cst_41 {dimension_numbers = #tpu.dot_dimension_numbers<[1], [0], [0], [1], [0, 0, 1, 1], [], []>} : vector<2x32xf32>, vector<32x128xf32>, vector<2x128xf32> -> vector<2x128xf32>
    %106 = arith.addf %103, %105 : vector<2x128xf32>
    %107 = arith.negf %106 : vector<2x128xf32>
    %108 = math.exp %107 : vector<2x128xf32>
    %cst_42 = arith.constant 1.000000e+00 : f32
    %109 = vector.broadcast %cst_42 : f32 to vector<2x128xf32>
    %110 = arith.addf %109, %108 : vector<2x128xf32>
    %111 = arith.divf %109, %110 : vector<2x128xf32>
    %112 = math.tanh %106 : vector<2x128xf32>
    %113 = vector.extract_strided_slice %111 {offsets = [0, 0], sizes = [2, 32], strides = [1, 1]} : vector<2x128xf32> to vector<2x32xf32>
    %114 = vector.extract_strided_slice %111 {offsets = [0, 32], sizes = [2, 32], strides = [1, 1]} : vector<2x128xf32> to vector<2x32xf32>
    %115 = vector.extract_strided_slice %112 {offsets = [0, 64], sizes = [2, 32], strides = [1, 1]} : vector<2x128xf32> to vector<2x32xf32>
    %116 = vector.extract_strided_slice %111 {offsets = [0, 96], sizes = [2, 32], strides = [1, 1]} : vector<2x128xf32> to vector<2x32xf32>
    %117 = arith.mulf %114, %96 : vector<2x32xf32>
    %118 = arith.mulf %113, %115 : vector<2x32xf32>
    %119 = arith.addf %117, %118 : vector<2x32xf32>
    %120 = math.tanh %119 : vector<2x32xf32>
    %121 = arith.mulf %116, %120 : vector<2x32xf32>
    %122 = arith.index_cast %101 : i32 to index
    %c0_43 = arith.constant 0 : index
    %123 = vector.load %arg12[%122, %c0_43] : memref<16x32xf32, #tpu.memory_space<vmem>>, vector<2x32xf32>
    tpu.vector_store %arg12[%122, %c0_43], %121 {strides = array<i32>} : memref<16x32xf32, #tpu.memory_space<vmem>>, vector<2x32xf32>,
    %c5_i32 = arith.constant 5 : i32
    %c2_i32_44 = arith.constant 2 : i32
    %124 = arith.muli %c5_i32, %c2_i32_44 : i32
    %125 = arith.index_cast %124 : i32 to index
    %c0_45 = arith.constant 0 : index
    %126 = vector.load %arg11[%125, %c0_45] : memref<16x128xf32, #tpu.memory_space<vmem>>, vector<2x128xf32>
    %c0_46 = arith.constant 0 : index
    %c0_47 = arith.constant 0 : index
    %127 = vector.load %arg2[%c0_46, %c0_47] : memref<32x128xf32, #tpu.memory_space<vmem>>, vector<32x128xf32>
    %cst_48 = arith.constant dense<0.000000e+00> : vector<2x128xf32>
    %128 = tpu.matmul %121, %127, %cst_48 {dimension_numbers = #tpu.dot_dimension_numbers<[1], [0], [0], [1], [0, 0, 1, 1], [], []>} : vector<2x32xf32>, vector<32x128xf32>, vector<2x128xf32> -> vector<2x128xf32>
    %129 = arith.addf %126, %128 : vector<2x128xf32>
    %130 = arith.negf %129 : vector<2x128xf32>
    %131 = math.exp %130 : vector<2x128xf32>
    %cst_49 = arith.constant 1.000000e+00 : f32
    %132 = vector.broadcast %cst_49 : f32 to vector<2x128xf32>
    %133 = arith.addf %132, %131 : vector<2x128xf32>
    %134 = arith.divf %132, %133 : vector<2x128xf32>
    %135 = math.tanh %129 : vector<2x128xf32>
    %136 = vector.extract_strided_slice %134 {offsets = [0, 0], sizes = [2, 32], strides = [1, 1]} : vector<2x128xf32> to vector<2x32xf32>
    %137 = vector.extract_strided_slice %134 {offsets = [0, 32], sizes = [2, 32], strides = [1, 1]} : vector<2x128xf32> to vector<2x32xf32>
    %138 = vector.extract_strided_slice %135 {offsets = [0, 64], sizes = [2, 32], strides = [1, 1]} : vector<2x128xf32> to vector<2x32xf32>
    %139 = vector.extract_strided_slice %134 {offsets = [0, 96], sizes = [2, 32], strides = [1, 1]} : vector<2x128xf32> to vector<2x32xf32>
    %140 = arith.mulf %137, %119 : vector<2x32xf32>
    %141 = arith.mulf %136, %138 : vector<2x32xf32>
    %142 = arith.addf %140, %141 : vector<2x32xf32>
    %143 = math.tanh %142 : vector<2x32xf32>
    %144 = arith.mulf %139, %143 : vector<2x32xf32>
    %145 = arith.index_cast %124 : i32 to index
    %c0_50 = arith.constant 0 : index
    %146 = vector.load %arg12[%145, %c0_50] : memref<16x32xf32, #tpu.memory_space<vmem>>, vector<2x32xf32>
    tpu.vector_store %arg12[%145, %c0_50], %144 {strides = array<i32>} : memref<16x32xf32, #tpu.memory_space<vmem>>, vector<2x32xf32>,
    %c6_i32 = arith.constant 6 : i32
    %c2_i32_51 = arith.constant 2 : i32
    %147 = arith.muli %c6_i32, %c2_i32_51 : i32
    %148 = arith.index_cast %147 : i32 to index
    %c0_52 = arith.constant 0 : index
    %149 = vector.load %arg11[%148, %c0_52] : memref<16x128xf32, #tpu.memory_space<vmem>>, vector<2x128xf32>
    %c0_53 = arith.constant 0 : index
    %c0_54 = arith.constant 0 : index
    %150 = vector.load %arg2[%c0_53, %c0_54] : memref<32x128xf32, #tpu.memory_space<vmem>>, vector<32x128xf32>
    %cst_55 = arith.constant dense<0.000000e+00> : vector<2x128xf32>
    %151 = tpu.matmul %144, %150, %cst_55 {dimension_numbers = #tpu.dot_dimension_numbers<[1], [0], [0], [1], [0, 0, 1, 1], [], []>} : vector<2x32xf32>, vector<32x128xf32>, vector<2x128xf32> -> vector<2x128xf32>
    %152 = arith.addf %149, %151 : vector<2x128xf32>
    %153 = arith.negf %152 : vector<2x128xf32>
    %154 = math.exp %153 : vector<2x128xf32>
    %cst_56 = arith.constant 1.000000e+00 : f32
    %155 = vector.broadcast %cst_56 : f32 to vector<2x128xf32>
    %156 = arith.addf %155, %154 : vector<2x128xf32>
    %157 = arith.divf %155, %156 : vector<2x128xf32>
    %158 = math.tanh %152 : vector<2x128xf32>
    %159 = vector.extract_strided_slice %157 {offsets = [0, 0], sizes = [2, 32], strides = [1, 1]} : vector<2x128xf32> to vector<2x32xf32>
    %160 = vector.extract_strided_slice %157 {offsets = [0, 32], sizes = [2, 32], strides = [1, 1]} : vector<2x128xf32> to vector<2x32xf32>
    %161 = vector.extract_strided_slice %158 {offsets = [0, 64], sizes = [2, 32], strides = [1, 1]} : vector<2x128xf32> to vector<2x32xf32>
    %162 = vector.extract_strided_slice %157 {offsets = [0, 96], sizes = [2, 32], strides = [1, 1]} : vector<2x128xf32> to vector<2x32xf32>
    %163 = arith.mulf %160, %142 : vector<2x32xf32>
    %164 = arith.mulf %159, %161 : vector<2x32xf32>
    %165 = arith.addf %163, %164 : vector<2x32xf32>
    %166 = math.tanh %165 : vector<2x32xf32>
    %167 = arith.mulf %162, %166 : vector<2x32xf32>
    %168 = arith.index_cast %147 : i32 to index
    %c0_57 = arith.constant 0 : index
    %169 = vector.load %arg12[%168, %c0_57] : memref<16x32xf32, #tpu.memory_space<vmem>>, vector<2x32xf32>
    tpu.vector_store %arg12[%168, %c0_57], %167 {strides = array<i32>} : memref<16x32xf32, #tpu.memory_space<vmem>>, vector<2x32xf32>,
    %c7_i32 = arith.constant 7 : i32
    %c2_i32_58 = arith.constant 2 : i32
    %170 = arith.muli %c7_i32, %c2_i32_58 : i32
    %171 = arith.index_cast %170 : i32 to index
    %c0_59 = arith.constant 0 : index
    %172 = vector.load %arg11[%171, %c0_59] : memref<16x128xf32, #tpu.memory_space<vmem>>, vector<2x128xf32>
    %c0_60 = arith.constant 0 : index
    %c0_61 = arith.constant 0 : index
    %173 = vector.load %arg2[%c0_60, %c0_61] : memref<32x128xf32, #tpu.memory_space<vmem>>, vector<32x128xf32>
    %cst_62 = arith.constant dense<0.000000e+00> : vector<2x128xf32>
    %174 = tpu.matmul %167, %173, %cst_62 {dimension_numbers = #tpu.dot_dimension_numbers<[1], [0], [0], [1], [0, 0, 1, 1], [], []>} : vector<2x32xf32>, vector<32x128xf32>, vector<2x128xf32> -> vector<2x128xf32>
    %175 = arith.addf %172, %174 : vector<2x128xf32>
    %176 = arith.negf %175 : vector<2x128xf32>
    %177 = math.exp %176 : vector<2x128xf32>
    %cst_63 = arith.constant 1.000000e+00 : f32
    %178 = vector.broadcast %cst_63 : f32 to vector<2x128xf32>
    %179 = arith.addf %178, %177 : vector<2x128xf32>
    %180 = arith.divf %178, %179 : vector<2x128xf32>
    %181 = math.tanh %175 : vector<2x128xf32>
    %182 = vector.extract_strided_slice %180 {offsets = [0, 0], sizes = [2, 32], strides = [1, 1]} : vector<2x128xf32> to vector<2x32xf32>
    %183 = vector.extract_strided_slice %180 {offsets = [0, 32], sizes = [2, 32], strides = [1, 1]} : vector<2x128xf32> to vector<2x32xf32>
    %184 = vector.extract_strided_slice %181 {offsets = [0, 64], sizes = [2, 32], strides = [1, 1]} : vector<2x128xf32> to vector<2x32xf32>
    %185 = vector.extract_strided_slice %180 {offsets = [0, 96], sizes = [2, 32], strides = [1, 1]} : vector<2x128xf32> to vector<2x32xf32>
    %186 = arith.mulf %183, %165 : vector<2x32xf32>
    %187 = arith.mulf %182, %184 : vector<2x32xf32>
    %188 = arith.addf %186, %187 : vector<2x32xf32>
    %189 = math.tanh %188 : vector<2x32xf32>
    %190 = arith.mulf %185, %189 : vector<2x32xf32>
    %191 = arith.index_cast %170 : i32 to index
    %c0_64 = arith.constant 0 : index
    %192 = vector.load %arg12[%191, %c0_64] : memref<16x32xf32, #tpu.memory_space<vmem>>, vector<2x32xf32>
    tpu.vector_store %arg12[%191, %c0_64], %190 {strides = array<i32>} : memref<16x32xf32, #tpu.memory_space<vmem>>, vector<2x32xf32>,
    %c8_i32 = arith.constant 8 : i32
    %c0_65 = arith.constant 0 : index
    %c0_66 = arith.constant 0 : index
    %193 = vector.load %arg12[%c0_65, %c0_66] : memref<16x32xf32, #tpu.memory_space<vmem>>, vector<16x32xf32>
    %c0_67 = arith.constant 0 : index
    %c0_68 = arith.constant 0 : index
    %194 = vector.load %arg4[%c0_67, %c0_68] : memref<32x32xf32, #tpu.memory_space<vmem>>, vector<32x32xf32>
    %cst_69 = arith.constant dense<0.000000e+00> : vector<16x32xf32>
    %195 = tpu.matmul %193, %194, %cst_69 {dimension_numbers = #tpu.dot_dimension_numbers<[1], [0], [0], [1], [0, 0, 1, 1], [], []>} : vector<16x32xf32>, vector<32x32xf32>, vector<16x32xf32> -> vector<16x32xf32>
    %c0_70 = arith.constant 0 : index
    %c0_71 = arith.constant 0 : index
    %196 = vector.load %arg5[%c0_70, %c0_71] : memref<1x32xf32, #tpu.memory_space<vmem>>, vector<1x32xf32>
    %197 = vector.broadcast %196 : vector<1x32xf32> to vector<16x32xf32>
    %198 = arith.addf %195, %197 : vector<16x32xf32>
    %cst_72 = arith.constant 0.000000e+00 : f32
    %199 = vector.broadcast %cst_72 : f32 to vector<16x32xf32>
    %200 = arith.maximumf %198, %199 : vector<16x32xf32>
    %c0_73 = arith.constant 0 : index
    %c0_74 = arith.constant 0 : index
    %201 = vector.load %arg6[%c0_73, %c0_74] : memref<32x32xf32, #tpu.memory_space<vmem>>, vector<32x32xf32>
    %cst_75 = arith.constant dense<0.000000e+00> : vector<16x32xf32>
    %202 = tpu.matmul %200, %201, %cst_75 {dimension_numbers = #tpu.dot_dimension_numbers<[1], [0], [0], [1], [0, 0, 1, 1], [], []>} : vector<16x32xf32>, vector<32x32xf32>, vector<16x32xf32> -> vector<16x32xf32>
    %c0_76 = arith.constant 0 : index
    %c0_77 = arith.constant 0 : index
    %203 = vector.load %arg7[%c0_76, %c0_77] : memref<1x32xf32, #tpu.memory_space<vmem>>, vector<1x32xf32>
    %204 = vector.broadcast %203 : vector<1x32xf32> to vector<16x32xf32>
    %205 = arith.addf %202, %204 : vector<16x32xf32>
    %cst_78 = arith.constant 0.000000e+00 : f32
    %206 = vector.broadcast %cst_78 : f32 to vector<16x32xf32>
    %207 = arith.maximumf %205, %206 : vector<16x32xf32>
    %c0_79 = arith.constant 0 : index
    %c0_80 = arith.constant 0 : index
    %208 = vector.load %arg8[%c0_79, %c0_80] : memref<32x4xf32, #tpu.memory_space<vmem>>, vector<32x4xf32>
    %cst_81 = arith.constant dense<0.000000e+00> : vector<16x4xf32>
    %209 = tpu.matmul %207, %208, %cst_81 {dimension_numbers = #tpu.dot_dimension_numbers<[1], [0], [0], [1], [0, 0, 1, 1], [], []>} : vector<16x32xf32>, vector<32x4xf32>, vector<16x4xf32> -> vector<16x4xf32>
    %c0_82 = arith.constant 0 : index
    %c0_83 = arith.constant 0 : index
    %210 = vector.load %arg9[%c0_82, %c0_83] : memref<1x4xf32, #tpu.memory_space<vmem>>, vector<1x4xf32>
    %211 = vector.broadcast %210 : vector<1x4xf32> to vector<16x4xf32>
    %212 = arith.addf %209, %211 : vector<16x4xf32>
    %c0_84 = arith.constant 0 : index
    %c0_85 = arith.constant 0 : index
    %213 = vector.load %arg10[%c0_84, %c0_85] : memref<16x4xf32, #tpu.memory_space<vmem>>, vector<16x4xf32>
    tpu.vector_store %arg10[%c0_84, %c0_85], %212 {strides = array<i32>} : memref<16x4xf32, #tpu.memory_space<vmem>>, vector<16x4xf32>,
    return
  }
}

</mosaic_0001>

<bundles_post_ra>
// kernel: tpu_custom_call.1
= control target key start
LH: loop header
LB: loop body
LE: loop exit
PB: predicated region body
PF: predicated region fallthrough
CT: control target
= control target key end

     0   :  { %15 = vsyncpa [#allocation5], 0  ;;  %s1981_s0 = inlined_call_operand.vmem [shape: f32[16,4], index: 0, kind: input, shape index: {}]   ;;  %s1982_s1 = inlined_call_operand.hbm [shape: f32[4,128], index: 1, kind: input, shape index: {}]   ;;  %s1983_s2 = inlined_call_operand.vmem [shape: f32[32,128], index: 2, kind: input, shape index: {}]   ;;  %s1984_s3 = inlined_call_operand.vmem [shape: f32[1,128], index: 3, kind: input, shape index: {}]   ;;  %s1985_s4 = inlined_call_operand.vmem [shape: f32[32,32], index: 4, kind: input, shape index: {}]   ;;  %s1986_s5 = inlined_call_operand.vmem [shape: f32[1,32], index: 5, kind: input, shape index: {}]   ;;  %s1987_s6 = inlined_call_operand.hbm [shape: f32[32,32], index: 6, kind: input, shape index: {}]   ;;  %s1988_s7 = inlined_call_operand.vmem [shape: f32[1,32], index: 7, kind: input, shape index: {}]   ;;  %s1989_s8 = inlined_call_operand.vmem [shape: f32[32,4], index: 8, kind: input, shape index: {}]   ;;  %s1990_s9 = inlined_call_operand.vmem [shape: f32[1,4], index: 9, kind: input, shape index: {}]   ;;  %s1991_s10 = inlined_call_operand.vmem [shape: f32[16,4], index: 10, kind: output, shape index: {}]  }
   0x1   :  { %16 = vsyncpa [#allocation7], 0  ;;  %s1716_s13 = smov [#allocation4]   ;;  %s1717_s15 = smov [#allocation6]  }
   0x2   :  { %s25_s14 = sshll.u32 %s1716_s13, 4  ;;  %s42_s16 = sshll.u32 %s1717_s15, 4  ;;  %s26_s14 = int_to_ptr.vmem [resolvable:$true] %s25_s14  ;;  %s1780_s16 = int_to_ptr.vmem [resolvable:$true] %s42_s16 }
   0x3   :  { %s1668_s19 = scalar_lea.hbm %s1982_s1, 64 }
   0x4   :  { %p1669_p0 = scmp.ne.s32.totalorder %s1982_s1, %s1668_s19  ;;  %p1672_p1 = scmp.lt.u32.totalorder %s1668_s19, %s1982_s1 }
   0x6   :  { %p1674_p2 = pnand %p1672_p1, %p1669_p0 }
   0x8   :  { %1677 = shalt.err (!%p1674_p2)
}
   0x9   :  { %s1678_s24 = scalar_lea.vmem %s26_s14, 64  ;;  %p1683_p4 = scmp.lt.s32.totalorder %s26_s14, %s26_s14 }
   0xa   :  { %p1679_p3 = scmp.ne.s32.totalorder %s26_s14, %s1678_s24  ;;  %p1684_p5 = scmp.lt.s32.totalorder %s1678_s24, %s1678_s24 }
   0xc   :  { %p1685_p6 = por %p1684_p5, %p1683_p4 }
   0xe   :  { %p1686_p7 = pnand %p1685_p6, %p1679_p3 }
  0x10   :  { %1689 = shalt.err (!%p1686_p7)
}
  0x11   :  { %28 = dma.hbm_to_vmem [thread:$0]  %s1982_s1, 64, %s26_s14, [#allocation5]  }
  0x12   :  { %s1690_s29 = scalar_lea.hbm %s1987_s6, 512 }
  0x13   :  { %p1691_p8 = scmp.ne.s32.totalorder %s1987_s6, %s1690_s29  ;;  %p1694_p9 = scmp.lt.u32.totalorder %s1690_s29, %s1987_s6 }
  0x15   :  { %p1696_p10 = pnand %p1694_p9, %p1691_p8 }
  0x17   :  { %1699 = shalt.err (!%p1696_p10)
}
  0x18   :  { %s1700_s15 = scalar_lea.vmem %s1780_s16, 512  ;;  %p1705_p12 = scmp.lt.s32.totalorder %s1780_s16, %s1780_s16 }
  0x19   :  { %p1701_p11 = scmp.ne.s32.totalorder %s1780_s16, %s1700_s15  ;;  %p1706_p13 = scmp.lt.s32.totalorder %s1700_s15, %s1700_s15 }
  0x1b   :  { %p1707_p0 = por %p1706_p13, %p1705_p12 }
  0x1d   :  { %p1708_p1 = pnand %p1707_p0, %p1701_p11 }
  0x1f   :  { %1711 = shalt.err (!%p1708_p1)
}
  0x20   :  { %s1718_s1 = smov 128   ;;  %s1719_s14 = smov 8  }
  0x21   :  { %48 = dma.hbm_to_vmem [thread:$0]  %s1987_s6, 512, %s1780_s16, [#allocation7], %s1718_s1, %s1718_s1, %s1719_s14  }
  0x22   :  { %1712 = dma.done.wait [#allocation5], 64  }
  0x23   :  { %1713 = vsyncadd [#allocation5], 4294967232 }
  0x24   :  { %1714 = dma.done.wait [#allocation7], 512  }
  0x25   :  { %1715 = vsyncadd [#allocation7], 4294966784  ;;  %v1720_v0 = vmov 0.0|0.0   ;;  %vm1721_vm0 = vmmov 0   ;;  %v1722_v1 = vmov 0.0   ;;  %vm78_vm1 = vcmask 1043456  }
  0x26   :  { %1523 = vmatprep.subr.bf16.mxu1 %v1720_v0  ;;  %1410 = vmatprep.mubr.msk.f32.mxu1 %vm1721_vm0, %v1722_v1  ;;  %vm71_vm2 = vcmask 31744   ;;  %v63_v2 = vld [vmem:[#allocation4] sm:$0xf]  ;;  %v62_v4 = vld [vmem:[%s1981_s0 + $0x8] sm:$0xff]  ;;  %v162_v7 = vld [vmem:[%s1983_s2 + $0x10] sm:$0xff]  ;;  %s1723_s29 = smov 64  }
  0x27   :  { %v61_v3 = vld [vmem:[%s1981_s0] sm:$0xff]  ;;  %1397 = vmatprep.subr.msk.mxu0 %vm78_vm1, %v63_v2  ;;  %v161_v6 = vld [vmem:[%s1983_s2 + $0x8] sm:$0xff]  ;;  %v163_v9 = vld [vmem:[%s1983_s2 + $0x18] sm:$0xff]  ;;  %vm267_vm3 = vcmask 254976   ;;  %vm164_vm4 = vcmask 261120  }
  0x28   :  { %1399 = vmatprep.mubr.msk.f32.mxu0 %vm71_vm2, %v61_v3  ;;  %v160_v5 = vld [vmem:[%s1983_s2] sm:$0xff]  ;;  %1398 = vmatpush3.msk.msra.mxu0 %vm78_vm1, %v63_v2  ;;  %v1838_v10 = vpack.c.bf16 %v163_v9, %v162_v7 }
  0x29   :  { %v1830_v8 = vpack.c.bf16 %v161_v6, %v160_v5  ;;  %1400 = vmatmul.mubr.msk.f32.vlgmr.msra.gmra.mrb[0].mxu0 %vm71_vm2, %v62_v4  ;;  %1529 = vmatprep.subr.bf16.mxu0 %v1720_v0  ;;  %v1308_v11 = vld [vmem:[%s1984_s3] ss:$0 sm:$0xff]  ;;  %s1724_s3 = smov 32  }
  0x2a   :  { %1421 = vmatprep.mubr.msk.f32.mxu0 %vm1721_vm0, %v1722_v1 }
  0x2b   :  { %1525 = vmatpush3.bf16.msra.mxu1 %v1830_v8  ;;  %1531 = vmatpush3.bf16.msra.mxu0 %v1830_v8 }
  0x2c   :  { %1526 = vmatprep.subr.bf16.mxu1 %v1720_v0  ;;  %1532 = vmatprep.subr.bf16.mxu0 %v1720_v0 }
  0x2f   :  { %1528 = vmatpush3.bf16.msra.mxu1 %v1838_v10  ;;  %1534 = vmatpush3.bf16.msra.mxu0 %v1838_v10 }
  0x30   :  { %1535 = vmatprep.subr.bf16.mxu1 %v1720_v0  ;;  %1541 = vmatprep.subr.bf16.mxu0 %v1720_v0 }
  0x32   :  { %1411 = vmatmul.mubr.f32.vlgmr.msra.gmra.mrb[0].mxu1 %v1722_v1 }
  0x33   :  { %1537 = vmatpush3.bf16.msra.mxu1 %v1830_v8  ;;  %1432 = vmatprep.mubr.msk.f32.mxu1 %vm1721_vm0, %v1722_v1 }
  0x34   :  { %1538 = vmatprep.subr.bf16.mxu1 %v1720_v0 }
  0x37   :  { %1540 = vmatpush3.bf16.msra.mxu1 %v1838_v10 }
  0x38   :  { %1547 = vmatprep.subr.bf16.mxu1 %v1720_v0 }
  0xfc   :  { %v1401_v12 = vpop.f32.mrb[0].mxu0 }
  0xfd   :  { %v154_v13 = vadd.f32 %v1401_v12, %v1308_v11  ;;  %v148_v14 = vpop.f32.mrb[1].mxu0 }
  0xfe   :  { %v149_v15 = vadd.f32 %v1308_v11, %v148_v14 }
  0xff   :  { %158 = vst [vmem:[#allocation2 + $0x8] sm:$0xff] %v154_v13 }
 0x100   :  { %157 = vst [vmem:[#allocation2] sm:$0xff] %v149_v15 }
 0x105   :  { %v234_v16 = vpop.f32.mrb[0].mxu1 }
 0x106   :  { %v1412_v17 = vpop.f32.mrb[1].mxu1 }
 0x107   :  { %v159_v18 = vld [vmem:[#allocation2] sm:$0x3]  ;;  %v269_v34 = vld [vmem:[#allocation2 + $0x2] sm:$0x3]  ;;  %v376_v52 = vld [vmem:[#allocation2 + $0x4] sm:$0x3] }
 0x108   :  { %v238_v19 = vadd.f32 %v234_v16, %v159_v18  ;;  %v483_v9 = vld [vmem:[#allocation2 + $0x6] sm:$0x3] }
 0x10a   :  { %1604 = vtanh.f32 %v238_v19  ;;  %v1312_v21 = vmul.f32 -1.442695, %v238_v19 }
 0x10c   :  { %1606 = vpow2.f32 %v1312_v21 }
 0x114   :  { %v1605_v20 = vpop.eup %1604 }
 0x115   :  { %248 = vrot.lane.b32.xlu0 %v1605_v20, %s1723_s29 }
 0x116   :  { %v1607_v22 = vpop.eup %1606 }
 0x117   :  { %v242_v23 = vadd.f32 1.0, %v1607_v22 }
 0x119   :  { %1608 = vrcp.f32 %v242_v23 }
 0x123   :  { %v1609_v24 = vpop.eup %1608 }
 0x124   :  { %v246_v27 = vmul.f32 0.0, %v1609_v24 }
 0x187   :  { %v249_v25 = vpop.permute.xlu0 %248 }
 0x188   :  { %v251_v26 = vmul.f32 %v1609_v24, %v249_v25 }
 0x18a   :  { %253 = vrot.lane.b32.xlu0 %v251_v26, %s1724_s3 }
 0x1fc   :  { %v254_v28 = vpop.permute.xlu0 %253 }
 0x1fd   :  { %v256_v29 = vadd.f32 %v254_v28, %v246_v27  ;;  %v590_v28 = vld [vmem:[#allocation2 + $0x8] sm:$0x3] }
 0x1ff   :  { %1610 = vtanh.f32 %v256_v29 }
 0x209   :  { %v1611_v30 = vpop.eup %1610 }
 0x20a   :  { %259 = vrot.lane.b32.xlu1 %v1611_v30, %s1723_s29 }
 0x27c   :  { %v260_v31 = vpop.permute.xlu1 %259 }
 0x27d   :  { %v262_v32 = vmul.f32 %v1609_v24, %v260_v31 }
 0x27f   :  { %264 = vrot.lane.b32.xlu1 %v262_v32, %s1724_s3 }
 0x2f1   :  { %v265_v33 = vpop.permute.xlu1 %264 }
 0x2f2   :  { %268 = vst.msk [vmem:[#allocation3] sm:$0x3] %vm267_vm3, %v265_v33  ;;  %1422 = vmatmul.mubr.msk.f32.vlgmr.msra.gmra.mrb[2].mxu0 %vm164_vm4, %v265_v33 }
 0x2f3   :  { %1543 = vmatpush3.bf16.msra.mxu0 %v1830_v8  ;;  %1443 = vmatprep.mubr.msk.f32.mxu0 %vm1721_vm0, %v1722_v1 }
 0x2f4   :  { %1544 = vmatprep.subr.bf16.mxu0 %v1720_v0 }
 0x2f7   :  { %1546 = vmatpush3.bf16.msra.mxu0 %v1838_v10 }
 0x2f8   :  { %1553 = vmatprep.subr.bf16.mxu0 %v1720_v0 }
 0x3c5   :  { %v342_v35 = vpop.f32.mrb[2].mxu0 }
 0x3c6   :  { %v346_v36 = vadd.f32 %v342_v35, %v269_v34  ;;  %v1423_v37 = vpop.f32.mrb[3].mxu0 }
 0x3c8   :  { %1612 = vtanh.f32 %v346_v36  ;;  %v1314_v39 = vmul.f32 -1.442695, %v346_v36 }
 0x3ca   :  { %1614 = vpow2.f32 %v1314_v39 }
 0x3d2   :  { %v1613_v38 = vpop.eup %1612 }
 0x3d3   :  { %356 = vrot.lane.b32.xlu0 %v1613_v38, %s1723_s29 }
 0x3d4   :  { %v1615_v40 = vpop.eup %1614 }
 0x3d5   :  { %v350_v41 = vadd.f32 1.0, %v1615_v40 }
 0x3d7   :  { %1616 = vrcp.f32 %v350_v41 }
 0x3e1   :  { %v1617_v42 = vpop.eup %1616 }
 0x3e2   :  { %v354_v45 = vmul.f32 %v1617_v42, %v256_v29 }
 0x445   :  { %v357_v43 = vpop.permute.xlu0 %356 }
 0x446   :  { %v359_v44 = vmul.f32 %v1617_v42, %v357_v43 }
 0x448   :  { %361 = vrot.lane.b32.xlu1 %v359_v44, %s1724_s3 }
 0x4ba   :  { %v362_v46 = vpop.permute.xlu1 %361 }
 0x4bb   :  { %v364_v47 = vadd.f32 %v362_v46, %v354_v45  ;;  %v697_v46 = vld [vmem:[#allocation2 + $0xa] sm:$0x3] }
 0x4bd   :  { %1618 = vtanh.f32 %v364_v47 }
 0x4c7   :  { %v1619_v48 = vpop.eup %1618 }
 0x4c8   :  { %367 = vrot.lane.b32.xlu0 %v1619_v48, %s1723_s29 }
 0x53a   :  { %v368_v49 = vpop.permute.xlu0 %367 }
 0x53b   :  { %v370_v50 = vmul.f32 %v1617_v42, %v368_v49 }
 0x53d   :  { %372 = vrot.lane.b32.xlu1 %v370_v50, %s1724_s3 }
 0x5af   :  { %v373_v51 = vpop.permute.xlu1 %372 }
 0x5b0   :  { %375 = vst.msk [vmem:[#allocation3 + $0x2] sm:$0x3] %vm267_vm3, %v373_v51  ;;  %1433 = vmatmul.mubr.msk.f32.vlgmr.msra.gmra.mrb[2].mxu1 %vm164_vm4, %v373_v51 }
 0x5b1   :  { %1549 = vmatpush3.bf16.msra.mxu1 %v1830_v8  ;;  %1454 = vmatprep.mubr.msk.f32.mxu1 %vm1721_vm0, %v1722_v1 }
 0x5b2   :  { %1550 = vmatprep.subr.bf16.mxu1 %v1720_v0 }
 0x5b5   :  { %1552 = vmatpush3.bf16.msra.mxu1 %v1838_v10 }
 0x5b6   :  { %1559 = vmatprep.subr.bf16.mxu1 %v1720_v0 }
 0x683   :  { %v449_v53 = vpop.f32.mrb[2].mxu1 }
 0x684   :  { %v453_v54 = vadd.f32 %v449_v53, %v376_v52  ;;  %v1434_v55 = vpop.f32.mrb[3].mxu1 }
 0x686   :  { %1620 = vtanh.f32 %v453_v54  ;;  %v1316_v57 = vmul.f32 -1.442695, %v453_v54 }
 0x688   :  { %1622 = vpow2.f32 %v1316_v57 }
 0x690   :  { %v1621_v56 = vpop.eup %1620 }
 0x691   :  { %463 = vrot.lane.b32.xlu0 %v1621_v56, %s1723_s29 }
 0x692   :  { %v1623_v58 = vpop.eup %1622 }
 0x693   :  { %v457_v59 = vadd.f32 1.0, %v1623_v58 }
 0x695   :  { %1624 = vrcp.f32 %v457_v59 }
 0x69f   :  { %v1625_v60 = vpop.eup %1624 }
 0x6a0   :  { %v461_v63 = vmul.f32 %v1625_v60, %v364_v47 }
 0x703   :  { %v464_v61 = vpop.permute.xlu0 %463 }
 0x704   :  { %v466_v62 = vmul.f32 %v1625_v60, %v464_v61  ;;  %v804_v61 = vld [vmem:[#allocation2 + $0xc] sm:$0x3] }
 0x706   :  { %468 = vrot.lane.b32.xlu1 %v466_v62, %s1724_s3 }
 0x778   :  { %v469_v2 = vpop.permute.xlu1 %468 }
 0x779   :  { %v471_v3 = vadd.f32 %v469_v2, %v461_v63 }
 0x77b   :  { %1626 = vtanh.f32 %v471_v3 }
 0x785   :  { %v1627_v4 = vpop.eup %1626 }
 0x786   :  { %474 = vrot.lane.b32.xlu0 %v1627_v4, %s1723_s29 }
 0x7f8   :  { %v475_v5 = vpop.permute.xlu0 %474 }
 0x7f9   :  { %v477_v6 = vmul.f32 %v1625_v60, %v475_v5 }
 0x7fb   :  { %479 = vrot.lane.b32.xlu1 %v477_v6, %s1724_s3 }
 0x86d   :  { %v480_v7 = vpop.permute.xlu1 %479 }
 0x86e   :  { %482 = vst.msk [vmem:[#allocation3 + $0x4] sm:$0x3] %vm267_vm3, %v480_v7  ;;  %1444 = vmatmul.mubr.msk.f32.vlgmr.msra.gmra.mrb[4].mxu0 %vm164_vm4, %v480_v7 }
 0x86f   :  { %1555 = vmatpush3.bf16.msra.mxu0 %v1830_v8  ;;  %1465 = vmatprep.mubr.msk.f32.mxu0 %vm1721_vm0, %v1722_v1 }
 0x870   :  { %1556 = vmatprep.subr.bf16.mxu0 %v1720_v0 }
 0x873   :  { %1558 = vmatpush3.bf16.msra.mxu0 %v1838_v10 }
 0x874   :  { %1565 = vmatprep.subr.bf16.mxu0 %v1720_v0 }
 0x941   :  { %v556_v11 = vpop.f32.mrb[4].mxu0 }
 0x942   :  { %v560_v12 = vadd.f32 %v556_v11, %v483_v9  ;;  %v1445_v13 = vpop.f32.mrb[5].mxu0 }
 0x944   :  { %1628 = vtanh.f32 %v560_v12  ;;  %v1318_v15 = vmul.f32 -1.442695, %v560_v12 }
 0x946   :  { %1630 = vpow2.f32 %v1318_v15 }
 0x94e   :  { %v1629_v14 = vpop.eup %1628 }
 0x94f   :  { %570 = vrot.lane.b32.xlu0 %v1629_v14, %s1723_s29 }
 0x950   :  { %v1631_v16 = vpop.eup %1630 }
 0x951   :  { %v564_v17 = vadd.f32 1.0, %v1631_v16 }
 0x953   :  { %1632 = vrcp.f32 %v564_v17 }
 0x95d   :  { %v1633_v18 = vpop.eup %1632 }
 0x95e   :  { %v568_v21 = vmul.f32 %v1633_v18, %v471_v3 }
 0x9c1   :  { %v571_v19 = vpop.permute.xlu0 %570 }
 0x9c2   :  { %v573_v20 = vmul.f32 %v1633_v18, %v571_v19  ;;  %v911_v19 = vld [vmem:[#allocation2 + $0xe] sm:$0x3] }
 0x9c4   :  { %575 = vrot.lane.b32.xlu1 %v573_v20, %s1724_s3 }
 0xa36   :  { %v576_v22 = vpop.permute.xlu1 %575 }
 0xa37   :  { %v578_v23 = vadd.f32 %v576_v22, %v568_v21 }
 0xa39   :  { %1634 = vtanh.f32 %v578_v23 }
 0xa43   :  { %v1635_v24 = vpop.eup %1634 }
 0xa44   :  { %581 = vrot.lane.b32.xlu0 %v1635_v24, %s1723_s29 }
 0xab6   :  { %v582_v25 = vpop.permute.xlu0 %581 }
 0xab7   :  { %v584_v26 = vmul.f32 %v1633_v18, %v582_v25 }
 0xab9   :  { %586 = vrot.lane.b32.xlu1 %v584_v26, %s1724_s3 }
 0xb2b   :  { %v587_v27 = vpop.permute.xlu1 %586 }
 0xb2c   :  { %589 = vst.msk [vmem:[#allocation3 + $0x6] sm:$0x3] %vm267_vm3, %v587_v27  ;;  %1455 = vmatmul.mubr.msk.f32.vlgmr.msra.gmra.mrb[4].mxu1 %vm164_vm4, %v587_v27 }
 0xb2d   :  { %1561 = vmatpush3.bf16.msra.mxu1 %v1830_v8  ;;  %1476 = vmatprep.mubr.msk.f32.mxu1 %vm1721_vm0, %v1722_v1 }
 0xb2e   :  { %1562 = vmatprep.subr.bf16.mxu1 %v1720_v0 }
 0xb31   :  { %1564 = vmatpush3.bf16.msra.mxu1 %v1838_v10 }
 0xb33   :  { %v1018_v60 = vld [vmem:[#allocation3] sm:$0xff] }
 0xbff   :  { %v663_v29 = vpop.f32.mrb[4].mxu1 }
 0xc00   :  { %v667_v30 = vadd.f32 %v663_v29, %v590_v28  ;;  %v1456_v31 = vpop.f32.mrb[5].mxu1 }
 0xc02   :  { %1636 = vtanh.f32 %v667_v30  ;;  %v1320_v33 = vmul.f32 -1.442695, %v667_v30 }
 0xc04   :  { %1638 = vpow2.f32 %v1320_v33 }
 0xc0c   :  { %v1637_v32 = vpop.eup %1636 }
 0xc0d   :  { %677 = vrot.lane.b32.xlu0 %v1637_v32, %s1723_s29 }
 0xc0e   :  { %v1639_v34 = vpop.eup %1638 }
 0xc0f   :  { %v671_v35 = vadd.f32 1.0, %v1639_v34  ;;  %v1020_v34 = vld [vmem:[%s1985_s4] sm:$0xff] }
 0xc11   :  { %1640 = vrcp.f32 %v671_v35  ;;  %v1021_v35 = vld [vmem:[%s1985_s4 + $0x8] sm:$0xff] }
 0xc1b   :  { %v1641_v36 = vpop.eup %1640 }
 0xc1c   :  { %v675_v39 = vmul.f32 %v1641_v36, %v578_v23 }
 0xc7f   :  { %v678_v37 = vpop.permute.xlu0 %677 }
 0xc80   :  { %v680_v38 = vmul.f32 %v1641_v36, %v678_v37  ;;  %v1022_v37 = vld [vmem:[%s1985_s4 + $0x10] sm:$0xff] }
 0xc82   :  { %682 = vrot.lane.b32.xlu1 %v680_v38, %s1724_s3  ;;  %v1023_v38 = vld [vmem:[%s1985_s4 + $0x18] sm:$0xff] }
 0xcf4   :  { %v683_v40 = vpop.permute.xlu1 %682 }
 0xcf5   :  { %v685_v41 = vadd.f32 %v683_v40, %v675_v39  ;;  %v1575_v39 = vpack.c.bf16 %v1023_v38, %v1022_v37  ;;  %v1114_v40 = vld [vmem:[#allocation6] sm:$0xff] }
 0xcf7   :  { %1642 = vtanh.f32 %v685_v41 }
 0xd01   :  { %v1643_v42 = vpop.eup %1642 }
 0xd02   :  { %688 = vrot.lane.b32.xlu0 %v1643_v42, %s1723_s29 }
 0xd74   :  { %v689_v43 = vpop.permute.xlu0 %688 }
 0xd75   :  { %v691_v44 = vmul.f32 %v1641_v36, %v689_v43  ;;  %v1571_v36 = vpack.c.bf16 %v1021_v35, %v1020_v34 }
 0xd77   :  { %693 = vrot.lane.b32.xlu1 %v691_v44, %s1724_s3  ;;  %1572 = vmatprep.subr.bf16.mxu1 %v1571_v36 }
 0xde9   :  { %v694_v45 = vpop.permute.xlu1 %693 }
 0xdea   :  { %696 = vst.msk [vmem:[#allocation3 + $0x8] sm:$0x3] %vm267_vm3, %v694_v45  ;;  %1466 = vmatmul.mubr.msk.f32.vlgmr.msra.gmra.mrb[6].mxu0 %vm164_vm4, %v694_v45 }
 0xdeb   :  { %1567 = vmatpush3.bf16.msra.mxu0 %v1830_v8  ;;  %1487 = vmatprep.mubr.msk.f32.mxu0 %vm1721_vm0, %v1722_v1 }
 0xdec   :  { %1568 = vmatprep.subr.bf16.mxu0 %v1720_v0 }
 0xdef   :  { %1570 = vmatpush3.bf16.msra.mxu0 %v1838_v10 }
 0xebd   :  { %v770_v47 = vpop.f32.mrb[6].mxu0 }
 0xebe   :  { %v774_v48 = vadd.f32 %v770_v47, %v697_v46  ;;  %v1467_v49 = vpop.f32.mrb[7].mxu0  ;;  %v1116_v47 = vld [vmem:[#allocation6 + $0x10] sm:$0xff] }
 0xec0   :  { %1644 = vtanh.f32 %v774_v48  ;;  %v1322_v51 = vmul.f32 -1.442695, %v774_v48  ;;  %v1117_v48 = vld [vmem:[#allocation6 + $0x18] sm:$0xff] }
 0xec1   :  { %v1583_v49 = vpack.c.bf16 %v1117_v48, %v1116_v47 }
 0xec2   :  { %1646 = vpow2.f32 %v1322_v51  ;;  %v1209_v51 = vld [vmem:[%s1989_s8 + $0x8] sm:$0xff] }
 0xeca   :  { %v1645_v50 = vpop.eup %1644 }
 0xecb   :  { %784 = vrot.lane.b32.xlu0 %v1645_v50, %s1723_s29  ;;  %v1208_v50 = vld [vmem:[%s1989_s8] sm:$0xff] }
 0xecc   :  { %v1647_v52 = vpop.eup %1646 }
 0xecd   :  { %v778_v53 = vadd.f32 1.0, %v1647_v52  ;;  %v1587_v52 = vpack.c.bf16 %v1209_v51, %v1208_v50 }
 0xecf   :  { %1648 = vrcp.f32 %v778_v53  ;;  %v1327_v53 = vld [vmem:[%s1986_s5] ss:$0 sm:$0xff] }
 0xed9   :  { %v1649_v8 = vpop.eup %1648 }
 0xeda   :  { %v782_v0 = vmul.f32 %v1649_v8, %v685_v41  ;;  %v1115_v41 = vld [vmem:[#allocation6 + $0x8] sm:$0xff] }
 0xedb   :  { %v1579_v42 = vpack.c.bf16 %v1115_v41, %v1114_v40 }
 0xedd   :  { %1580 = vmatprep.subr.bf16.mxu0 %v1579_v42 }
 0xf3d   :  { %v785_v54 = vpop.permute.xlu0 %784 }
 0xf3e   :  { %v787_v1 = vmul.f32 %v1649_v8, %v785_v54 }
 0xf40   :  { %789 = vrot.lane.b32.xlu1 %v787_v1, %s1724_s3 }
 0xfb2   :  { %v790_v10 = vpop.permute.xlu1 %789 }
 0xfb3   :  { %v792_v55 = vadd.f32 %v790_v10, %v782_v0 }
 0xfb5   :  { %1650 = vtanh.f32 %v792_v55 }
 0xfbf   :  { %v1651_v56 = vpop.eup %1650 }
 0xfc0   :  { %795 = vrot.lane.b32.xlu0 %v1651_v56, %s1723_s29  ;;  %v1210_v56 = vld [vmem:[%s1989_s8 + $0x10] sm:$0xff] }
0x1032   :  { %v796_v57 = vpop.permute.xlu0 %795 }
0x1033   :  { %v798_v58 = vmul.f32 %v1649_v8, %v796_v57  ;;  %v1211_v57 = vld [vmem:[%s1989_s8 + $0x18] sm:$0xff] }
0x1035   :  { %800 = vrot.lane.b32.xlu1 %v798_v58, %s1724_s3  ;;  %v1591_v58 = vpack.c.bf16 %v1211_v57, %v1210_v56 }
0x10a7   :  { %v801_v59 = vpop.permute.xlu1 %800 }
0x10a8   :  { %803 = vst.msk [vmem:[#allocation3 + $0xa] sm:$0x3] %vm267_vm3, %v801_v59  ;;  %1477 = vmatmul.mubr.msk.f32.vlgmr.msra.gmra.mrb[6].mxu1 %vm164_vm4, %v801_v59  ;;  %v1330_v59 = vld [vmem:[%s1988_s7] ss:$0 sm:$0xff] }
0x10a9   :  { %1498 = vmatprep.mubr.msk.f32.mxu1 %vm164_vm4, %v1018_v60  ;;  %1574 = vmatpush3.bf16.msra.mxu1 %v1571_v36 }
0x10aa   :  { %1576 = vmatprep.subr.bf16.mxu1 %v1575_v39 }
0x10ad   :  { %1578 = vmatpush3.bf16.msra.mxu1 %v1575_v39 }
0x10ae   :  { %1588 = vmatprep.subr.bf16.mxu1 %v1587_v52 }
0x117b   :  { %v877_v62 = vpop.f32.mrb[6].mxu1 }
0x117c   :  { %v881_v63 = vadd.f32 %v877_v62, %v804_v61  ;;  %v1478_v2 = vpop.f32.mrb[7].mxu1 }
0x117e   :  { %1652 = vtanh.f32 %v881_v63  ;;  %v1324_v4 = vmul.f32 -1.442695, %v881_v63 }
0x1180   :  { %1654 = vpow2.f32 %v1324_v4  ;;  %v1333_v4 = vld [vmem:[%s1990_s9] ss:$0 sm:$0xff] }
0x1188   :  { %v1653_v3 = vpop.eup %1652 }
0x1189   :  { %891 = vrot.lane.b32.xlu0 %v1653_v3, %s1723_s29 }
0x118a   :  { %v1655_v5 = vpop.eup %1654 }
0x118b   :  { %v885_v6 = vadd.f32 1.0, %v1655_v5 }
0x118d   :  { %1656 = vrcp.f32 %v885_v6 }
0x1197   :  { %v1657_v7 = vpop.eup %1656 }
0x1198   :  { %v889_v12 = vmul.f32 %v1657_v7, %v792_v55 }
0x11fb   :  { %v892_v9 = vpop.permute.xlu0 %891 }
0x11fc   :  { %v894_v11 = vmul.f32 %v1657_v7, %v892_v9 }
0x11fe   :  { %896 = vrot.lane.b32.xlu1 %v894_v11, %s1724_s3 }
0x1270   :  { %v897_v13 = vpop.permute.xlu1 %896 }
0x1271   :  { %v899_v14 = vadd.f32 %v897_v13, %v889_v12 }
0x1273   :  { %1658 = vtanh.f32 %v899_v14 }
0x127d   :  { %v1659_v15 = vpop.eup %1658 }
0x127e   :  { %902 = vrot.lane.b32.xlu0 %v1659_v15, %s1723_s29 }
0x12f0   :  { %v903_v16 = vpop.permute.xlu0 %902 }
0x12f1   :  { %v905_v17 = vmul.f32 %v1657_v7, %v903_v16 }
0x12f3   :  { %907 = vrot.lane.b32.xlu1 %v905_v17, %s1724_s3 }
0x1365   :  { %v908_v18 = vpop.permute.xlu1 %907 }
0x1366   :  { %910 = vst.msk [vmem:[#allocation3 + $0xc] sm:$0x3] %vm267_vm3, %v908_v18  ;;  %1488 = vmatmul.mubr.msk.f32.vlgmr.msra.gmra.mrb[8].mxu0 %vm164_vm4, %v908_v18 }
0x1367   :  { %1582 = vmatpush3.bf16.msra.mxu0 %v1579_v42 }
0x1368   :  { %1584 = vmatprep.subr.bf16.mxu0 %v1583_v49 }
0x136b   :  { %1586 = vmatpush3.bf16.msra.mxu0 %v1583_v49 }
0x1439   :  { %v984_v20 = vpop.f32.mrb[8].mxu0 }
0x143a   :  { %v988_v21 = vadd.f32 %v984_v20, %v911_v19  ;;  %v1489_v22 = vpop.f32.mrb[9].mxu0 }
0x143c   :  { %1660 = vtanh.f32 %v988_v21  ;;  %v1326_v24 = vmul.f32 -1.442695, %v988_v21 }
0x143e   :  { %1662 = vpow2.f32 %v1326_v24 }
0x1446   :  { %v1661_v23 = vpop.eup %1660 }
0x1447   :  { %998 = vrot.lane.b32.xlu0 %v1661_v23, %s1723_s29 }
0x1448   :  { %v1663_v25 = vpop.eup %1662 }
0x1449   :  { %v992_v26 = vadd.f32 1.0, %v1663_v25 }
0x144b   :  { %1664 = vrcp.f32 %v992_v26 }
0x1455   :  { %v1665_v27 = vpop.eup %1664 }
0x1456   :  { %v996_v30 = vmul.f32 %v1665_v27, %v899_v14 }
0x14b9   :  { %v999_v28 = vpop.permute.xlu0 %998 }
0x14ba   :  { %v1001_v29 = vmul.f32 %v1665_v27, %v999_v28 }
0x14bc   :  { %1003 = vrot.lane.b32.xlu1 %v1001_v29, %s1724_s3 }
0x152e   :  { %v1004_v31 = vpop.permute.xlu1 %1003 }
0x152f   :  { %v1006_v32 = vadd.f32 %v1004_v31, %v996_v30 }
0x1531   :  { %1666 = vtanh.f32 %v1006_v32 }
0x153b   :  { %v1667_v33 = vpop.eup %1666 }
0x153c   :  { %1009 = vrot.lane.b32.xlu0 %v1667_v33, %s1723_s29 }
0x15ae   :  { %v1010_v43 = vpop.permute.xlu0 %1009 }
0x15af   :  { %v1012_v44 = vmul.f32 %v1665_v27, %v1010_v43 }
0x15b1   :  { %1014 = vrot.lane.b32.xlu1 %v1012_v44, %s1724_s3 }
0x1623   :  { %v1015_v45 = vpop.permute.xlu1 %1014 }
0x1624   :  { %1017 = vst.msk [vmem:[#allocation3 + $0xe] sm:$0x3] %vm267_vm3, %v1015_v45 }
0x162b   :  { %v1019_v46 = vld [vmem:[#allocation3 + $0x8] sm:$0xff] }
0x162c   :  { %1499 = vmatmul.mubr.msk.f32.vlgmr.msra.gmra.mrb[8].mxu1 %vm164_vm4, %v1019_v46 }
0x162d   :  { %1590 = vmatpush3.bf16.msra.mxu1 %v1587_v52 }
0x162e   :  { %1592 = vmatprep.subr.bf16.mxu1 %v1591_v58 }
0x1631   :  { %1594 = vmatpush3.bf16.msra.mxu1 %v1591_v58 }
0x16ff   :  { %v1500_v8 = vpop.f32.mrb[8].mxu1 }
0x1700   :  { %v1109_v54 = vadd.f32 %v1500_v8, %v1327_v53  ;;  %v1103_v1 = vpop.f32.mrb[9].mxu1 }
0x1701   :  { %v1104_v0 = vadd.f32 %v1327_v53, %v1103_v1 }
0x1702   :  { %v1113_v55 = vmax.f32 %v1109_v54, 0.0 }
0x1703   :  { %v1112_v10 = vmax.f32 %v1104_v0, 0.0 }
0x1705   :  { %1509 = vmatprep.mubr.msk.f32.mxu0 %vm164_vm4, %v1112_v10 }
0x1706   :  { %1510 = vmatmul.mubr.msk.f32.vlgmr.msra.gmra.mrb[10].mxu0 %vm164_vm4, %v1113_v55 }
0x17d9   :  { %v1511_v60 = vpop.f32.mrb[10].mxu0 }
0x17da   :  { %v1203_v61 = vadd.f32 %v1511_v60, %v1330_v59  ;;  %v1197_v62 = vpop.f32.mrb[11].mxu0 }
0x17db   :  { %v1198_v63 = vadd.f32 %v1330_v59, %v1197_v62 }
0x17dc   :  { %v1207_v3 = vmax.f32 %v1203_v61, 0.0 }
0x17dd   :  { %v1206_v2 = vmax.f32 %v1198_v63, 0.0 }
0x17df   :  { %1520 = vmatprep.mubr.msk.f32.mxu1 %vm164_vm4, %v1206_v2 }
0x17e0   :  { %1521 = vmatmul.mubr.msk.f32.vlgmr.msra.gmra.mrb[10].mxu1 %vm164_vm4, %v1207_v3 }
0x18b3   :  { %v1522_v5 = vpop.f32.mrb[10].mxu1 }
0x18b4   :  { %v1297_v6 = vadd.f32 %v1522_v5, %v1333_v4  ;;  %v1291_v7 = vpop.f32.mrb[11].mxu1 }
0x18b5   :  { %v1292_v9 = vadd.f32 %v1333_v4, %v1291_v7 }
0x18b6   :  { %1301 = vst.msk [vmem:[%s1991_s10 + $0x8] sm:$0xff] %vm71_vm2, %v1297_v6 }
0x18b7   :  { %1300 = vst.msk [vmem:[%s1991_s10] sm:$0xff] %vm71_vm2, %v1292_v9 }
0x18b8   :  { %1306 = vsyncpa [#allocation5], 1 }
0x18b9   :  { %1307 = vsyncpa [#allocation7], 1 }

</bundles_post_ra>
